<compile_context>
chip_gen: v7x
topology: tpu7x:2x2x1
jax: 0.10.0
libtpu: 0.0.40
codegen_flags: <defaults>
</compile_context>

<pallas_src>
import jax
import jax.numpy as jnp
from jax.experimental import pallas as pl
from jax.experimental.pallas import tpu as pltpu

IN_F = 2        # fc1 in_features
H1 = 120        # fc1 out_features
H2 = 40         # fc2 out_features
OUT_F = 6       # fc3 out_features
PAD = 128       # lane-friendly padded feature width


def mlp_kernel(x_ref, w1_ref, b1_ref, w2_ref, b2_ref, w3_ref, b3_ref, o_ref):
    x = x_ref[...]                                          # (TB, 2) f32

    # fc1 + ReLU on the VPU: K=2 -> two broadcast FMAs, skip the MXU entirely.
    h1 = (x[:, 0:1] * w1_ref[0:1, :]
          + x[:, 1:2] * w1_ref[1:2, :]
          + b1_ref[...])                                    # (TB, 128)
    h1 = jnp.maximum(h1, 0.0)

    # fc2 + ReLU on the MXU (zero-padded 128x128 weight tile, K=128).
    h2 = jnp.dot(h1, w2_ref[...], preferred_element_type=jnp.float32)
    h2 = jnp.maximum(h2 + b2_ref[...], 0.0)                 # (TB, 128)

    # fc3 on the MXU; output is a lane-dense (TB, 128) slab (cols 6..127 are 0).
    h3 = jnp.dot(h2, w3_ref[...], preferred_element_type=jnp.float32)
    o_ref[...] = (h3 + b3_ref[...]).astype(o_ref.dtype)


def _round_up(n, m):
    return ((n + m - 1) // m) * m


def complex_model_forward(x, padded_params, *, block_batch=256):
    """x: (B, 2) float32. padded_params: dict of zero-padded transposed weights."""
    B = x.shape[0]
    # Batch tile: multiple of 8; defaults to 256 rows (raise block_batch to
    # 1024-4096 for very large batches -- still tiny vs. VMEM at these widths).
    tb = min(block_batch, max(8, _round_up(B, 8)))
    Bp = _round_up(B, tb)
    if Bp != B:
        x = jnp.pad(x, ((0, Bp - B), (0, 0)))
    num_tiles = Bp // tb

    w1, b1, w2, b2, w3, b3 = (
        padded_params["w1"], padded_params["b1"],
        padded_params["w2"], padded_params["b2"],
        padded_params["w3"], padded_params["b3"],
    )

    # Constant block index -> weights/biases stay resident in VMEM across steps.
    resident = lambda a: pl.BlockSpec(a.shape, lambda i: (0,) * a.ndim)

    out_padded = pl.pallas_call(
        mlp_kernel,
        out_shape=jax.ShapeDtypeStruct((Bp, PAD), jnp.float32),
        grid=(num_tiles,),
        in_specs=[
            pl.BlockSpec((tb, IN_F), lambda i: (i, 0)),     # x: tiled over batch
            resident(w1), resident(b1),
            resident(w2), resident(b2),
            resident(w3), resident(b3),
        ],
        out_specs=pl.BlockSpec((tb, PAD), lambda i: (i, 0)),  # lane-dense slab
        compiler_params=pltpu.CompilerParams(
            dimension_semantics=("parallel",),               # megacore on v7x
        ),
    )(x, w1, b1, w2, b2, w3, b3)

    return out_padded[:B, :OUT_F]


def init_params(key):
    """Deterministic nn.Linear-style init; weights stored transposed (in, out)."""
    def linear_init(k, fan_in, fan_out):
        kw, kb = jax.random.split(k)
        bound = 1.0 / jnp.sqrt(fan_in)
        w = jax.random.uniform(kw, (fan_in, fan_out), jnp.float32, -bound, bound)
        b = jax.random.uniform(kb, (1, fan_out), jnp.float32, -bound, bound)
        return w, b

    k1, k2, k3 = jax.random.split(key, 3)
    w1, b1 = linear_init(k1, IN_F, H1)
    w2, b2 = linear_init(k2, H1, H2)
    w3, b3 = linear_init(k3, H2, OUT_F)
    return {"w1": w1, "b1": b1, "w2": w2, "b2": b2, "w3": w3, "b3": b3}


def pad_params(params):
    """Zero-pad weights/biases to lane-friendly 128-wide shapes (semantics-preserving)."""
    def pad2(a, rows, cols):
        return jnp.pad(a, ((0, rows - a.shape[0]), (0, cols - a.shape[1])))

    return {
        "w1": pad2(params["w1"], IN_F, PAD),   # (2, 128)
        "b1": pad2(params["b1"], 1, PAD),      # (1, 128)
        "w2": pad2(params["w2"], PAD, PAD),    # (128, 128), rows 120..127 zero
        "b2": pad2(params["b2"], 1, PAD),
        "w3": pad2(params["w3"], PAD, PAD),    # (128, 128), only 6 live columns
        "b3": pad2(params["b3"], 1, PAD),
    }


def reference_forward(x, params):
    h1 = jnp.maximum(x @ params["w1"] + params["b1"], 0.0)
    h2 = jnp.maximum(h1 @ params["w2"] + params["b2"], 0.0)
    return h2 @ params["w3"] + params["b3"]


if __name__ == "__main__":
    key = jax.random.PRNGKey(0)
    k_in, k_param = jax.random.split(key)

    batch = 512                      # 2 batch tiles of 256 -> exercises the grid
    x = jax.random.normal(k_in, (batch, IN_F), dtype=jnp.float32)

    params = init_params(k_param)
    padded = pad_params(params)

    out = complex_model_forward(x, padded, block_batch=256)
    out = jax.block_until_ready(out)

    ref = reference_forward(x, params)
    assert out.shape == (batch, OUT_F), out.shape
    # The kernel computes fc1 in exact f32 on the VPU, while the jnp reference's
    # f32 matmuls may use TPU's default reduced-precision (bf16-pass) MXU path,
    # so allow a small numerical slack.
    assert jnp.allclose(out, ref, atol=2e-2, rtol=2e-2), float(
        jnp.max(jnp.abs(out - ref)))

    print("KERNEL_OK")
</pallas_src>

<mosaic_0001>
module attributes {stable_mosaic.version = 11 : i64} {
  func.func @mlp_kernel(%arg0: i32, %arg1: memref<256x2xf32, #tpu.memory_space<vmem>>, %arg2: memref<2x128xf32, #tpu.memory_space<vmem>>, %arg3: memref<1x128xf32, #tpu.memory_space<vmem>>, %arg4: memref<128x128xf32, #tpu.memory_space<vmem>>, %arg5: memref<1x128xf32, #tpu.memory_space<vmem>>, %arg6: memref<128x128xf32, #tpu.memory_space<vmem>>, %arg7: memref<1x128xf32, #tpu.memory_space<vmem>>, %arg8: memref<256x128xf32, #tpu.memory_space<vmem>>) attributes {dimension_semantics = [#tpu.dimension_semantics<parallel>], iteration_bounds = array<i64: 2>, scalar_prefetch = 0 : i64, scratch_operands = 0 : i64, tpu.core_type = #tpu.core_type<tc>, window_params = [{transform_indices = @transform_0, window_bounds = array<i64: 256, 2>}, {pipeline_mode = #tpu.pipeline_mode<synchronous>, transform_indices = @transform_1, window_bounds = array<i64: 2, 128>}, {pipeline_mode = #tpu.pipeline_mode<synchronous>, transform_indices = @transform_2, window_bounds = array<i64: 1, 128>}, {pipeline_mode = #tpu.pipeline_mode<synchronous>, transform_indices = @transform_3, window_bounds = array<i64: 128, 128>}, {pipeline_mode = #tpu.pipeline_mode<synchronous>, transform_indices = @transform_4, window_bounds = array<i64: 1, 128>}, {pipeline_mode = #tpu.pipeline_mode<synchronous>, transform_indices = @transform_5, window_bounds = array<i64: 128, 128>}, {pipeline_mode = #tpu.pipeline_mode<synchronous>, transform_indices = @transform_6, window_bounds = array<i64: 1, 128>}, {transform_indices = @transform_7, window_bounds = array<i64: 256, 128>}]} {
    %c0 = arith.constant 0 : index
    %c0_0 = arith.constant 0 : index
    %0 = vector.load %arg1[%c0, %c0_0] : memref<256x2xf32, #tpu.memory_space<vmem>>, vector<256x2xf32>
    %1 = vector.extract_strided_slice %0 {offsets = [0, 0], sizes = [256, 1], strides = [1, 1]} : vector<256x2xf32> to vector<256x1xf32>
    %c0_1 = arith.constant 0 : index
    %c0_2 = arith.constant 0 : index
    %2 = vector.load %arg2[%c0_1, %c0_2] : memref<2x128xf32, #tpu.memory_space<vmem>>, vector<1x128xf32>
    %3 = vector.broadcast %1 : vector<256x1xf32> to vector<256x128xf32>
    %4 = vector.broadcast %2 : vector<1x128xf32> to vector<256x128xf32>
    %5 = arith.mulf %3, %4 : vector<256x128xf32>
    %6 = vector.extract_strided_slice %0 {offsets = [0, 1], sizes = [256, 1], strides = [1, 1]} : vector<256x2xf32> to vector<256x1xf32>
    %c1 = arith.constant 1 : index
    %c0_3 = arith.constant 0 : index
    %7 = vector.load %arg2[%c1, %c0_3] : memref<2x128xf32, #tpu.memory_space<vmem>>, vector<1x128xf32>
    %8 = vector.broadcast %6 : vector<256x1xf32> to vector<256x128xf32>
    %9 = vector.broadcast %7 : vector<1x128xf32> to vector<256x128xf32>
    %10 = arith.mulf %8, %9 : vector<256x128xf32>
    %11 = arith.addf %5, %10 : vector<256x128xf32>
    %c0_4 = arith.constant 0 : index
    %c0_5 = arith.constant 0 : index
    %12 = vector.load %arg3[%c0_4, %c0_5] : memref<1x128xf32, #tpu.memory_space<vmem>>, vector<1x128xf32>
    %13 = vector.broadcast %12 : vector<1x128xf32> to vector<256x128xf32>
    %14 = arith.addf %11, %13 : vector<256x128xf32>
    %cst = arith.constant 0.000000e+00 : f32
    %15 = vector.broadcast %cst : f32 to vector<256x128xf32>
    %16 = arith.maximumf %14, %15 : vector<256x128xf32>
    %c0_6 = arith.constant 0 : index
    %c0_7 = arith.constant 0 : index
    %17 = vector.load %arg4[%c0_6, %c0_7] : memref<128x128xf32, #tpu.memory_space<vmem>>, vector<128x128xf32>
    %cst_8 = arith.constant dense<0.000000e+00> : vector<256x128xf32>
    %18 = tpu.matmul %16, %17, %cst_8 {dimension_numbers = #tpu.dot_dimension_numbers<[1], [0], [0], [1], [0, 0, 1, 1], [], []>} : vector<256x128xf32>, vector<128x128xf32>, vector<256x128xf32> -> vector<256x128xf32>
    %c0_9 = arith.constant 0 : index
    %c0_10 = arith.constant 0 : index
    %19 = vector.load %arg5[%c0_9, %c0_10] : memref<1x128xf32, #tpu.memory_space<vmem>>, vector<1x128xf32>
    %20 = vector.broadcast %19 : vector<1x128xf32> to vector<256x128xf32>
    %21 = arith.addf %18, %20 : vector<256x128xf32>
    %cst_11 = arith.constant 0.000000e+00 : f32
    %22 = vector.broadcast %cst_11 : f32 to vector<256x128xf32>
    %23 = arith.maximumf %21, %22 : vector<256x128xf32>
    %c0_12 = arith.constant 0 : index
    %c0_13 = arith.constant 0 : index
    %24 = vector.load %arg6[%c0_12, %c0_13] : memref<128x128xf32, #tpu.memory_space<vmem>>, vector<128x128xf32>
    %cst_14 = arith.constant dense<0.000000e+00> : vector<256x128xf32>
    %25 = tpu.matmul %23, %24, %cst_14 {dimension_numbers = #tpu.dot_dimension_numbers<[1], [0], [0], [1], [0, 0, 1, 1], [], []>} : vector<256x128xf32>, vector<128x128xf32>, vector<256x128xf32> -> vector<256x128xf32>
    %c0_15 = arith.constant 0 : index
    %c0_16 = arith.constant 0 : index
    %26 = vector.load %arg7[%c0_15, %c0_16] : memref<1x128xf32, #tpu.memory_space<vmem>>, vector<1x128xf32>
    %27 = vector.broadcast %26 : vector<1x128xf32> to vector<256x128xf32>
    %28 = arith.addf %25, %27 : vector<256x128xf32>
    %c0_17 = arith.constant 0 : index
    %c0_18 = arith.constant 0 : index
    %29 = vector.load %arg8[%c0_17, %c0_18] : memref<256x128xf32, #tpu.memory_space<vmem>>, vector<256x128xf32>
    tpu.vector_store %arg8[%c0_17, %c0_18], %28 {strides = array<i32>} : memref<256x128xf32, #tpu.memory_space<vmem>>, vector<256x128xf32>,
    return
  }
  func.func @transform_0(%arg0: i32) -> (i32, i32) {
    %c0_i32 = arith.constant 0 : i32
    %c0_i32_0 = arith.constant 0 : i32
    return %arg0, %c0_i32 : i32, i32
  }
  func.func @transform_1(%arg0: i32) -> (i32, i32) {
    %c0_i32 = arith.constant 0 : i32
    %c0_i32_0 = arith.constant 0 : i32
    %c0_i32_1 = arith.constant 0 : i32
    return %c0_i32, %c0_i32_0 : i32, i32
  }
  func.func @transform_2(%arg0: i32) -> (i32, i32) {
    %c0_i32 = arith.constant 0 : i32
    %c0_i32_0 = arith.constant 0 : i32
    %c0_i32_1 = arith.constant 0 : i32
    return %c0_i32, %c0_i32_0 : i32, i32
  }
  func.func @transform_3(%arg0: i32) -> (i32, i32) {
    %c0_i32 = arith.constant 0 : i32
    %c0_i32_0 = arith.constant 0 : i32
    %c0_i32_1 = arith.constant 0 : i32
    return %c0_i32, %c0_i32_0 : i32, i32
  }
  func.func @transform_4(%arg0: i32) -> (i32, i32) {
    %c0_i32 = arith.constant 0 : i32
    %c0_i32_0 = arith.constant 0 : i32
    %c0_i32_1 = arith.constant 0 : i32
    return %c0_i32, %c0_i32_0 : i32, i32
  }
  func.func @transform_5(%arg0: i32) -> (i32, i32) {
    %c0_i32 = arith.constant 0 : i32
    %c0_i32_0 = arith.constant 0 : i32
    %c0_i32_1 = arith.constant 0 : i32
    return %c0_i32, %c0_i32_0 : i32, i32
  }
  func.func @transform_6(%arg0: i32) -> (i32, i32) {
    %c0_i32 = arith.constant 0 : i32
    %c0_i32_0 = arith.constant 0 : i32
    %c0_i32_1 = arith.constant 0 : i32
    return %c0_i32, %c0_i32_0 : i32, i32
  }
  func.func @transform_7(%arg0: i32) -> (i32, i32) {
    %c0_i32 = arith.constant 0 : i32
    %c0_i32_0 = arith.constant 0 : i32
    return %arg0, %c0_i32 : i32, i32
  }
}

</mosaic_0001>

<bundles_post_ra>
// kernel: tpu_custom_call.1
= control target key start
LH: loop header
LB: loop body
LE: loop exit
PB: predicated region body
PF: predicated region fallthrough
CT: control target
= control target key end

     0   :  { %12 = vsyncpa [#allocation3], 0  ;;  %s2364_s0 = inlined_call_operand.vmem [shape: f32[512,2], index: 0, kind: input, shape index: {}]   ;;  %s2365_s1 = inlined_call_operand.vmem [shape: f32[2,128], index: 1, kind: input, shape index: {}]   ;;  %s2366_s2 = inlined_call_operand.vmem [shape: f32[1,128], index: 2, kind: input, shape index: {}]   ;;  %s2367_s3 = inlined_call_operand.vmem [shape: f32[128,128], index: 3, kind: input, shape index: {}]   ;;  %s2368_s4 = inlined_call_operand.vmem [shape: f32[1,128], index: 4, kind: input, shape index: {}]   ;;  %s2369_s5 = inlined_call_operand.vmem [shape: f32[128,128], index: 5, kind: input, shape index: {}]   ;;  %s2370_s6 = inlined_call_operand.vmem [shape: f32[1,128], index: 6, kind: input, shape index: {}]   ;;  %s2371_s7 = inlined_call_operand.hbm [shape: f32[512,128], index: 7, kind: output, shape index: {}]  }
   0x1   :  { %14 = vsyncpa [#allocation3 + $0x1], 0  ;;  %s1908_s24 = smov 0   ;;  %s1910_s25 = smov 0  }
   0x2   :  { %s1912_s26 = smov 0   ;;  %s1914_s27 = smov 0  }
   0x3 LB: > { %s1929_s28 = sadd.s32 4294967295, %s1861_s27   ;;  %s1413_s29 = sadd.s32 4294967294, %s1861_s27   ;;  %s1861_s27 = sphi %s1914_s27, %s2377_s27   ;;  %s1857_s26 = sphi %s1912_s26, %s2376_s26   ;;  %s1853_s25 = sphi %s1910_s25, %s2375_s25   ;;  %s1849_s24 = sphi %s1908_s24, %s2374_s24  }
   0x4   : > { %s1933_s30 = sadd.s32 1, %s1861_s27   ;;  %s179_s8 = sadd.s32 1, %s1857_s26 }
   0x5   : > { %s176_s9 = ssub.s32 %s1861_s27, %s1933_s30  ;;  %p189_p0 = scmp.ne.s32.totalorder %s1857_s26, %s1853_s25 }
   0x6   : > { %p177_p1 = scmp.eq.s32.totalorder %s176_s9, 0  ;;  %p190_p2 = scmp.eq.s32.totalorder %s1929_s28, 1 }
   0x7   : > { %p195_p3 = scmp.ne.s32.totalorder %s1853_s25, %s1849_s24  ;;  %p196_p4 = scmp.eq.s32.totalorder %s1413_s29, 1 }
   0x8   : > { %s1944_s10 = scalar_select %p177_p1, %s1857_s26, %s179_s8  }
   0x9   : > { %p1946_p5 = por %p190_p2, %p189_p0  ;;  %p1950_p6 = por %p196_p4, %p195_p3 }
   0xa   : > { %p1416_p7 = scmp.ge.s32.totalorder %s1861_s27, 1  ;;  %p241_p8 = scmp.lt.s32.totalorder %s1861_s27, 3 }
   0xc   : > { %p242_p9 = pnand %p1416_p7, %p241_p8 }
   0xd   : > { %s1418_s13 = sshll.u32 (!%p242_p9), %s1929_s28, 5  ;;  %v777_v0 = vld [vmem:[%s2367_s3] sm:$0xff] (!%p242_p9)  ;;  %v778_v1 = vld [vmem:[%s2367_s3 + $0x8] sm:$0xff] (!%p242_p9)  ;;  %v779_v2 = vld [vmem:[%s2367_s3 + $0x10] sm:$0xff] (!%p242_p9)  ;;  %v1863_v3 = vmov (!%p242_p9), 0   ;;  %v1864_v15 = vmov (!%p242_p9), 1  }
   0xe   : > { %245 = sbr.rel (%p242_p9) target bundleno = 735 (0x2df), region = 48  ;;  %1796 = vset.pattern.permute.xlu1 (!%p242_p9), %v1863_v3  ;;  %1794 = vset.pattern.permute.xlu0 (!%p242_p9), %v1863_v3  ;;  %p274_p10 = scmp.lt.s32.totalorder (!%p242_p9), %s1418_s13, 63  ;;  %v1687_v4 = vpack.c.bf16 (!%p242_p9), %v778_v1, %v777_v0  ;;  %v780_v5 = vld [vmem:[%s2367_s3 + $0x18] sm:$0xff] (!%p242_p9)  ;;  %v781_v7 = vld [vmem:[%s2367_s3 + $0x20] sm:$0xff] (!%p242_p9)  ;;  %v782_v8 = vld [vmem:[%s2367_s3 + $0x28] sm:$0xff] (!%p242_p9) }
   0xf   : > { %v1691_v6 = vpack.c.bf16 (!%p242_p9), %v780_v5, %v779_v2  ;;  %v1695_v9 = vpack.c.bf16 (!%p242_p9), %v782_v8, %v781_v7  ;;  %v783_v12 = vld [vmem:[%s2367_s3 + $0x30] sm:$0xff] (!%p242_p9)  ;;  %v784_v13 = vld [vmem:[%s2367_s3 + $0x38] sm:$0xff] (!%p242_p9)  ;;  %v785_v16 = vld [vmem:[%s2367_s3 + $0x40] sm:$0xff] (!%p242_p9)  ;;  %s270_s21 = sand.u32 (!%p242_p9), 1, %s1853_s25   ;;  %s1865_s19 = smov (!%p242_p9), [#allocation2]  }
  0x10   : > { %1688 = vmatprep.subr.bf16.mxu0 (!%p242_p9), %v1687_v4  ;;  %v1699_v14 = vpack.c.bf16 (!%p242_p9), %v784_v13, %v783_v12  ;;  %v786_v17 = vld [vmem:[%s2367_s3 + $0x48] sm:$0xff] (!%p242_p9)  ;;  %v787_v20 = vld [vmem:[%s2367_s3 + $0x50] sm:$0xff] (!%p242_p9)  ;;  %v788_v22 = vld [vmem:[%s2367_s3 + $0x58] sm:$0xff] (!%p242_p9)  ;;  %s1417_s22 = sshll.u32 (!%p242_p9), %s270_s21, 8 }
  0x11   : > { %1690 = vmatpush3.bf16.msra.mxu0 (!%p242_p9), %v1687_v4  ;;  %v1703_v19 = vpack.c.bf16 (!%p242_p9), %v786_v17, %v785_v16  ;;  %v1707_v23 = vpack.c.bf16 (!%p242_p9), %v788_v22, %v787_v20  ;;  %v789_v24 = vld [vmem:[%s2367_s3 + $0x60] sm:$0xff] (!%p242_p9)  ;;  %v790_v25 = vld [vmem:[%s2367_s3 + $0x68] sm:$0xff] (!%p242_p9)  ;;  %v791_v28 = vld [vmem:[%s2367_s3 + $0x70] sm:$0xff] (!%p242_p9)  ;;  %s2248_s8 = scalar_lea.vmem (!%p242_p9), [#allocation2], %s1417_s22 }
  0x12   : > { %1692 = vmatprep.subr.bf16.mxu0 (!%p242_p9), %v1691_v6  ;;  %v1711_v27 = vpack.c.bf16 (!%p242_p9), %v790_v25, %v789_v24  ;;  %v792_v29 = vld [vmem:[%s2367_s3 + $0x78] sm:$0xff] (!%p242_p9)  ;;  %v2045_v60 = vld [vmem:[%s2365_s1] ss:$0 sm:$0xff] (!%p242_p9)  ;;  %v2050_v61 = vld [vmem:[%s2365_s1 + $0x1] ss:$0 sm:$0xff] (!%p242_p9) }
  0x13   : > { %v1715_v31 = vpack.c.bf16 (!%p242_p9), %v792_v29, %v791_v28  ;;  %v2059_v4 = vld [vmem:[%s2366_s2] ss:$0 sm:$0xff] (!%p242_p9)  ;;  %v1059_v7 = vld [vmem:[%s2369_s5 + $0x10] sm:$0xff] (!%p242_p9) }
  0x14   : > { %v1057_v5 = vld [vmem:[%s2369_s5] sm:$0xff] (!%p242_p9) }
  0x15   : > { %s2379_s13 = smov (!%p274_p10, %s1418_s13), 63  ;;  %1694 = vmatpush3.bf16.msra.mxu0 %v1691_v6  ;;  %v1058_v6 = vld [vmem:[%s2369_s5 + $0x8] sm:$0xff] }
  0x16   : > { %s1419_s9 = sshll.u32 %s2379_s13, 3  ;;  %1696 = vmatprep.subr.bf16.mxu0 %v1695_v9  ;;  %s1803_s13 = sshll.u32 %s1865_s19, 4  ;;  %s1804_s13 = int_to_ptr.vmem [resolvable:$false] %s1803_s13 }
  0x17   : > { %s1978_s16 = scalar_lea.vmem %s2364_s0, %s1419_s9  ;;  %s1430_s9 = sshll.u32 %s1929_s28, 12 }
  0x18   : > { %v281_v10 = vld [vmem:[%s1978_s16 + $0x8] sm:$0xff]  ;;  %v280_v11 = vld [vmem:[%s1978_s16] sm:$0xff]  ;;  %v282_v18 = vld [vmem:[%s1978_s16 + $0x10] sm:$0xff]  ;;  %s2314_s17 = scalar_lea.hbm %s2371_s7, %s1430_s9  ;;  %s2323_s28 = scalar_lea.sflag [#allocation3], %s270_s21 }
  0x19   : > { %320 = vperm.xlu1 %1796, %v281_v10   ;;  %315 = vperm.xlu0 %1794, %v280_v11   ;;  %v283_v21 = vld [vmem:[%s1978_s16 + $0x18] sm:$0xff]  ;;  %v284_v26 = vld [vmem:[%s1978_s16 + $0x20] sm:$0xff]  ;;  %v285_v30 = vld [vmem:[%s1978_s16 + $0x28] sm:$0xff]  ;;  %s1805_s20 = scalar_lea.vmem %s1804_s13, 8192 }
  0x1a   : > { %1698 = vmatpush3.bf16.msra.mxu0 %v1695_v9  ;;  %v286_v32 = vld [vmem:[%s1978_s16 + $0x30] sm:$0xff]  ;;  %v287_v33 = vld [vmem:[%s1978_s16 + $0x38] sm:$0xff]  ;;  %v288_v34 = vld [vmem:[%s1978_s16 + $0x40] sm:$0xff] }
  0x1b   : > { %1700 = vmatprep.subr.bf16.mxu0 %v1699_v14  ;;  %v289_v35 = vld [vmem:[%s1978_s16 + $0x48] sm:$0xff]  ;;  %v290_v36 = vld [vmem:[%s1978_s16 + $0x50] sm:$0xff]  ;;  %v291_v37 = vld [vmem:[%s1978_s16 + $0x58] sm:$0xff] }
  0x1c   : > { %v292_v38 = vld [vmem:[%s1978_s16 + $0x60] sm:$0xff]  ;;  %v293_v39 = vld [vmem:[%s1978_s16 + $0x68] sm:$0xff]  ;;  %v294_v40 = vld [vmem:[%s1978_s16 + $0x70] sm:$0xff] }
  0x1d   : > { %1797 = vset.pattern.permute.xlu1 %v1864_v15  ;;  %1795 = vset.pattern.permute.xlu0 %v1864_v15  ;;  %v295_v41 = vld [vmem:[%s1978_s16 + $0x78] sm:$0xff]  ;;  %v296_v42 = vld [vmem:[%s1978_s16 + $0x80] sm:$0xff]  ;;  %v297_v43 = vld [vmem:[%s1978_s16 + $0x88] sm:$0xff] }
  0x1e   : > { %515 = vperm.xlu1 %1797, %v281_v10   ;;  %511 = vperm.xlu0 %1795, %v280_v11   ;;  %v298_v44 = vld [vmem:[%s1978_s16 + $0x90] sm:$0xff]  ;;  %v299_v45 = vld [vmem:[%s1978_s16 + $0x98] sm:$0xff]  ;;  %v300_v46 = vld [vmem:[%s1978_s16 + $0xa0] sm:$0xff]  ;;  %v1719_v10 = vpack.c.bf16 %v1058_v6, %v1057_v5 }
  0x1f   : > { %1702 = vmatpush3.bf16.msra.mxu0 %v1699_v14  ;;  %v301_v47 = vld [vmem:[%s1978_s16 + $0xa8] sm:$0xff]  ;;  %v302_v48 = vld [vmem:[%s1978_s16 + $0xb0] sm:$0xff]  ;;  %v303_v49 = vld [vmem:[%s1978_s16 + $0xb8] sm:$0xff] }
  0x20   : > { %1704 = vmatprep.subr.bf16.mxu0 %v1703_v19  ;;  %v304_v50 = vld [vmem:[%s1978_s16 + $0xc0] sm:$0xff]  ;;  %v305_v51 = vld [vmem:[%s1978_s16 + $0xc8] sm:$0xff]  ;;  %v306_v52 = vld [vmem:[%s1978_s16 + $0xd0] sm:$0xff]  ;;  %1720 = vmatprep.subr.bf16.mxu1 %v1719_v10 }
  0x21   : > { %v307_v53 = vld [vmem:[%s1978_s16 + $0xd8] sm:$0xff]  ;;  %v308_v54 = vld [vmem:[%s1978_s16 + $0xe0] sm:$0xff]  ;;  %v309_v55 = vld [vmem:[%s1978_s16 + $0xe8] sm:$0xff]  ;;  %1722 = vmatpush3.bf16.msra.mxu1 %v1719_v10 }
  0x22   : > { %1798 = vset.pattern.permute.xlu1 %v1863_v3  ;;  %519 = vperm.xlu0 %1795, %v282_v18   ;;  %v310_v56 = vld [vmem:[%s1978_s16 + $0xf0] sm:$0xff]  ;;  %v311_v57 = vld [vmem:[%s1978_s16 + $0xf8] sm:$0xff]  ;;  %v1061_v14 = vld [vmem:[%s2369_s5 + $0x20] sm:$0xff]  ;;  %s1351_s16 = sshll.u32 %s2248_s8, 4  ;;  %s2316_s16 = int_to_ptr.vmem [resolvable:$true] %s1351_s16 }
  0x23   : > { %325 = vperm.xlu1 %1798, %v282_v18   ;;  %1706 = vmatpush3.bf16.msra.mxu0 %v1703_v19  ;;  %v1060_v11 = vld [vmem:[%s2369_s5 + $0x18] sm:$0xff]  ;;  %v1062_v15 = vld [vmem:[%s2369_s5 + $0x28] sm:$0xff]  ;;  %s1799_s18 = scalar_lea.vmem %s2316_s16, 4096  ;;  %p1806_p0 = scmp.lt.s32.totalorder %s2316_s16, %s1804_s13 }
  0x24   : > { %1708 = vmatprep.subr.bf16.mxu0 %v1707_v23  ;;  %v1723_v13 = vpack.c.bf16 %v1060_v11, %v1059_v7  ;;  %p1800_p11 = scmp.ne.s32.totalorder %s2316_s16, %s1799_s18  ;;  %p1807_p1 = scmp.lt.s32.totalorder %s1805_s20, %s1799_s18 }
  0x26   : > { %523 = vperm.xlu0 %1795, %v283_v21   ;;  %1724 = vmatprep.subr.bf16.mxu1 %v1723_v13  ;;  %p1801_p12 = pnand %p1800_p11, %p1946_p5  ;;  %p1808_p2 = por %p1807_p1, %p1806_p0 }
  0x27   : > { %330 = vperm.xlu1 %1798, %v283_v21   ;;  %1710 = vmatpush3.bf16.msra.mxu0 %v1707_v23  ;;  %v1727_v23 = vpack.c.bf16 %v1062_v15, %v1061_v14 }
  0x28   : > { %1712 = vmatprep.subr.bf16.mxu0 %v1711_v27  ;;  %1726 = vmatpush3.bf16.msra.mxu1 %v1723_v13  ;;  %p1802_p13 = pneg %p1801_p12 }
  0x29   : > { %1728 = vmatprep.subr.bf16.mxu1 %v1727_v23 }
  0x2a   : > { %527 = vperm.xlu0 %1795, %v284_v26   ;;  %p1809_p3 = pnand %p1808_p2, %p1802_p13 }
  0x2b   : > { %335 = vperm.xlu1 %1798, %v284_v26   ;;  %1714 = vmatpush3.bf16.msra.mxu0 %v1711_v27  ;;  %v1063_v26 = vld [vmem:[%s2369_s5 + $0x30] sm:$0xff]  ;;  %v1064_v27 = vld [vmem:[%s2369_s5 + $0x38] sm:$0xff] }
  0x2c   : > { %1716 = vmatprep.subr.bf16.mxu0 %v1715_v31  ;;  %1730 = vmatpush3.bf16.msra.mxu1 %v1727_v23 }
  0x2e   : > { %531 = vperm.xlu0 %1795, %v285_v30  }
  0x2f   : > { %340 = vperm.xlu1 %1798, %v285_v30   ;;  %1718 = vmatpush3.bf16.msra.mxu0 %v1715_v31 }
  0x32   : > { %535 = vperm.xlu0 %1795, %v286_v32  }
  0x33   : > { %345 = vperm.xlu1 %1798, %v286_v32   ;;  %v1731_v32 = vpack.c.bf16 %v1064_v27, %v1063_v26 }
  0x35   : > { %1732 = vmatprep.subr.bf16.mxu1 %v1731_v32 }
  0x36   : > { %539 = vperm.xlu0 %1795, %v287_v33   ;;  %1734 = vmatpush3.bf16.msra.mxu1 %v1731_v32 }
  0x37   : > { %350 = vperm.xlu1 %1798, %v287_v33  }
  0x3a   : > { %543 = vperm.xlu0 %1795, %v288_v34  }
  0x3b   : > { %355 = vperm.xlu1 %1798, %v288_v34  }
  0x3e   : > { %547 = vperm.xlu0 %1795, %v289_v35  }
  0x3f   : > { %360 = vperm.xlu1 %1798, %v289_v35  }
  0x42   : > { %551 = vperm.xlu0 %1795, %v290_v36  }
  0x43   : > { %365 = vperm.xlu1 %1798, %v290_v36   ;;  %v1065_v36 = vld [vmem:[%s2369_s5 + $0x40] sm:$0xff] }
  0x46   : > { %555 = vperm.xlu0 %1795, %v291_v37  }
  0x47   : > { %370 = vperm.xlu1 %1798, %v291_v37   ;;  %v1066_v37 = vld [vmem:[%s2369_s5 + $0x48] sm:$0xff] }
  0x4a   : > { %559 = vperm.xlu0 %1795, %v292_v38  }
  0x4b   : > { %375 = vperm.xlu1 %1798, %v292_v38  }
  0x4e   : > { %563 = vperm.xlu0 %1795, %v293_v39  }
  0x4f   : > { %380 = vperm.xlu1 %1798, %v293_v39  }
  0x52   : > { %567 = vperm.xlu0 %1795, %v294_v40  }
  0x53   : > { %385 = vperm.xlu1 %1798, %v294_v40  }
  0x56   : > { %571 = vperm.xlu0 %1795, %v295_v41  }
  0x57   : > { %390 = vperm.xlu1 %1798, %v295_v41  }
  0x5a   : > { %575 = vperm.xlu0 %1795, %v296_v42  }
  0x5b   : > { %395 = vperm.xlu1 %1798, %v296_v42   ;;  %v1735_v42 = vpack.c.bf16 %v1066_v37, %v1065_v36 }
  0x5d   : > { %1736 = vmatprep.subr.bf16.mxu1 %v1735_v42 }
  0x5e   : > { %579 = vperm.xlu0 %1795, %v297_v43   ;;  %1738 = vmatpush3.bf16.msra.mxu1 %v1735_v42 }
  0x5f   : > { %400 = vperm.xlu1 %1798, %v297_v43  }
  0x62   : > { %583 = vperm.xlu0 %1795, %v298_v44  }
  0x63   : > { %405 = vperm.xlu1 %1798, %v298_v44  }
  0x66   : > { %587 = vperm.xlu0 %1795, %v299_v45  }
  0x67   : > { %410 = vperm.xlu1 %1798, %v299_v45  }
  0x6a   : > { %591 = vperm.xlu0 %1795, %v300_v46  }
  0x6b   : > { %415 = vperm.xlu1 %1798, %v300_v46   ;;  %v1067_v46 = vld [vmem:[%s2369_s5 + $0x50] sm:$0xff] }
  0x6e   : > { %595 = vperm.xlu0 %1795, %v301_v47  }
  0x6f   : > { %420 = vperm.xlu1 %1798, %v301_v47   ;;  %v1068_v47 = vld [vmem:[%s2369_s5 + $0x58] sm:$0xff] }
  0x72   : > { %599 = vperm.xlu0 %1795, %v302_v48  }
  0x73   : > { %425 = vperm.xlu1 %1798, %v302_v48  }
  0x76   : > { %603 = vperm.xlu0 %1795, %v303_v49  }
  0x77   : > { %430 = vperm.xlu1 %1798, %v303_v49  }
  0x7a   : > { %607 = vperm.xlu0 %1795, %v304_v50  }
  0x7b   : > { %435 = vperm.xlu1 %1798, %v304_v50  }
  0x7e   : > { %611 = vperm.xlu0 %1795, %v305_v51  }
  0x7f   : > { %440 = vperm.xlu1 %1798, %v305_v51  }
  0x82   : > { %615 = vperm.xlu0 %1795, %v306_v52  }
  0x83   : > { %445 = vperm.xlu1 %1798, %v306_v52   ;;  %v1739_v52 = vpack.c.bf16 %v1068_v47, %v1067_v46 }
  0x85   : > { %1740 = vmatprep.subr.bf16.mxu1 %v1739_v52 }
  0x86   : > { %619 = vperm.xlu0 %1795, %v307_v53   ;;  %1742 = vmatpush3.bf16.msra.mxu1 %v1739_v52 }
  0x87   : > { %450 = vperm.xlu1 %1798, %v307_v53  }
  0x8a   : > { %623 = vperm.xlu0 %1795, %v308_v54  }
  0x8b   : > { %455 = vperm.xlu1 %1798, %v308_v54  }
  0x8e   : > { %627 = vperm.xlu0 %1795, %v309_v55  }
  0x8f   : > { %460 = vperm.xlu1 %1798, %v309_v55  }
  0x92   : > { %631 = vperm.xlu0 %1795, %v310_v56  }
  0x93   : > { %465 = vperm.xlu1 %1798, %v310_v56   ;;  %v1069_v56 = vld [vmem:[%s2369_s5 + $0x60] sm:$0xff] }
  0x96   : > { %635 = vperm.xlu0 %1795, %v311_v57  }
  0x97   : > { %470 = vperm.xlu1 %1798, %v311_v57   ;;  %v1070_v57 = vld [vmem:[%s2369_s5 + $0x68] sm:$0xff] }
  0x98   : > { %v321_v58 = vpop.permute.xlu1 %320  ;;  %v316_v59 = vpop.permute.xlu0 %315 }
  0x99   : > { %v478_v0 = vmul.f32 %v2045_v60, %v321_v58  ;;  %v477_v1 = vmul.f32 %v2045_v60, %v316_v59 }
  0x9d   : > { %v516_v62 = vpop.permute.xlu1 %515  ;;  %v512_v63 = vpop.permute.xlu0 %511 }
  0x9e   : > { %v643_v2 = vmul.f32 %v2050_v61, %v516_v62  ;;  %v642_v3 = vmul.f32 %v2050_v61, %v512_v63 }
  0xa0   : > { %v675_v8 = vadd.f32 %v643_v2, %v478_v0  ;;  %v674_v9 = vadd.f32 %v642_v3, %v477_v1  ;;  %v1743_v0 = vpack.c.bf16 %v1070_v57, %v1069_v56 }
  0xa1   : > { %v520_v12 = vpop.permute.xlu0 %519 }
  0xa2   : > { %v644_v16 = vmul.f32 %v2050_v61, %v520_v12  ;;  %v326_v17 = vpop.permute.xlu1 %325  ;;  %v713_v18 = vadd.f32 %v2059_v4, %v674_v9  ;;  %v714_v19 = vadd.f32 %v2059_v4, %v675_v8  ;;  %1744 = vmatprep.subr.bf16.mxu1 %v1743_v0 }
  0xa3   : > { %v479_v20 = vmul.f32 %v2045_v60, %v326_v17  ;;  %1746 = vmatpush3.bf16.msra.mxu1 %v1743_v0 }
  0xa4   : > { %v745_v21 = vmax.f32 %v713_v18, 0.0  ;;  %v746_v22 = vmax.f32 %v714_v19, 0.0 }
  0xa5   : > { %v676_v24 = vadd.f32 %v644_v16, %v479_v20  ;;  %v524_v25 = vpop.permute.xlu0 %523 }
  0xa6   : > { %v645_v28 = vmul.f32 %v2050_v61, %v524_v25  ;;  %v331_v29 = vpop.permute.xlu1 %330  ;;  %1559 = vmatprep.mubr.f32.mxu0 %v745_v21 }
  0xa7   : > { %v480_v30 = vmul.f32 %v2045_v60, %v331_v29  ;;  %1560 = vmatmul.mubr.f32.vlgmr.msra.gmra.mrb[0].mxu0 %v746_v22  ;;  %v715_v31 = vadd.f32 %v2059_v4, %v676_v24 }
  0xa9   : > { %v677_v33 = vadd.f32 %v645_v28, %v480_v30  ;;  %v528_v34 = vpop.permute.xlu0 %527  ;;  %v747_v35 = vmax.f32 %v715_v31, 0.0 }
  0xaa   : > { %v646_v38 = vmul.f32 %v2050_v61, %v528_v34  ;;  %v336_v39 = vpop.permute.xlu1 %335 }
  0xab   : > { %v481_v40 = vmul.f32 %v2045_v60, %v336_v39  ;;  %1562 = vmatprep.mubr.f32.mxu0 %v747_v35  ;;  %v716_v41 = vadd.f32 %v2059_v4, %v677_v33 }
  0xad   : > { %v678_v43 = vadd.f32 %v646_v38, %v481_v40  ;;  %v532_v44 = vpop.permute.xlu0 %531  ;;  %v748_v45 = vmax.f32 %v716_v41, 0.0 }
  0xae   : > { %v647_v48 = vmul.f32 %v2050_v61, %v532_v44  ;;  %v341_v49 = vpop.permute.xlu1 %340 }
  0xaf   : > { %v482_v50 = vmul.f32 %v2045_v60, %v341_v49  ;;  %1563 = vmatmul.mubr.f32.gmra.mrb[2].mxu0 %v748_v45  ;;  %v717_v51 = vadd.f32 %v2059_v4, %v678_v43 }
  0xb1   : > { %v679_v53 = vadd.f32 %v647_v48, %v482_v50  ;;  %v536_v54 = vpop.permute.xlu0 %535  ;;  %v749_v55 = vmax.f32 %v717_v51, 0.0 }
  0xb2   : > { %v648_v58 = vmul.f32 %v2050_v61, %v536_v54  ;;  %v346_v59 = vpop.permute.xlu1 %345 }
  0xb3   : > { %v483_v62 = vmul.f32 %v2045_v60, %v346_v59  ;;  %1565 = vmatprep.mubr.f32.mxu0 %v749_v55  ;;  %v718_v63 = vadd.f32 %v2059_v4, %v679_v53 }
  0xb5   : > { %v680_v1 = vadd.f32 %v648_v58, %v483_v62  ;;  %v540_v2 = vpop.permute.xlu0 %539  ;;  %v750_v3 = vmax.f32 %v718_v63, 0.0 }
  0xb6   : > { %v649_v5 = vmul.f32 %v2050_v61, %v540_v2  ;;  %v351_v6 = vpop.permute.xlu1 %350 }
  0xb7   : > { %v484_v7 = vmul.f32 %v2045_v60, %v351_v6  ;;  %1566 = vmatmul.mubr.f32.gmra.mrb[4].mxu0 %v750_v3  ;;  %v719_v8 = vadd.f32 %v2059_v4, %v680_v1 }
  0xb9   : > { %v681_v9 = vadd.f32 %v649_v5, %v484_v7  ;;  %v544_v10 = vpop.permute.xlu0 %543  ;;  %v751_v11 = vmax.f32 %v719_v8, 0.0 }
  0xba   : > { %v650_v12 = vmul.f32 %v2050_v61, %v544_v10  ;;  %v356_v13 = vpop.permute.xlu1 %355 }
  0xbb   : > { %v485_v14 = vmul.f32 %v2045_v60, %v356_v13  ;;  %1568 = vmatprep.mubr.f32.mxu0 %v751_v11  ;;  %v720_v15 = vadd.f32 %v2059_v4, %v681_v9 }
  0xbd   : > { %v682_v16 = vadd.f32 %v650_v12, %v485_v14  ;;  %v548_v17 = vpop.permute.xlu0 %547  ;;  %v752_v18 = vmax.f32 %v720_v15, 0.0 }
  0xbe   : > { %v651_v19 = vmul.f32 %v2050_v61, %v548_v17  ;;  %v361_v20 = vpop.permute.xlu1 %360 }
  0xbf   : > { %v486_v21 = vmul.f32 %v2045_v60, %v361_v20  ;;  %1569 = vmatmul.mubr.f32.gmra.mrb[6].mxu0 %v752_v18  ;;  %v721_v22 = vadd.f32 %v2059_v4, %v682_v16 }
  0xc1   : > { %v683_v23 = vadd.f32 %v651_v19, %v486_v21  ;;  %v552_v24 = vpop.permute.xlu0 %551  ;;  %v753_v25 = vmax.f32 %v721_v22, 0.0 }
  0xc2   : > { %v652_v26 = vmul.f32 %v2050_v61, %v552_v24  ;;  %v366_v27 = vpop.permute.xlu1 %365 }
  0xc3   : > { %v487_v28 = vmul.f32 %v2045_v60, %v366_v27  ;;  %1571 = vmatprep.mubr.f32.mxu0 %v753_v25  ;;  %v722_v29 = vadd.f32 %v2059_v4, %v683_v23 }
  0xc5   : > { %v684_v30 = vadd.f32 %v652_v26, %v487_v28  ;;  %v556_v31 = vpop.permute.xlu0 %555  ;;  %v754_v32 = vmax.f32 %v722_v29, 0.0 }
  0xc6   : > { %v653_v33 = vmul.f32 %v2050_v61, %v556_v31  ;;  %v371_v34 = vpop.permute.xlu1 %370 }
  0xc7   : > { %v488_v35 = vmul.f32 %v2045_v60, %v371_v34  ;;  %1572 = vmatmul.mubr.f32.gmra.mrb[8].mxu0 %v754_v32  ;;  %v723_v36 = vadd.f32 %v2059_v4, %v684_v30 }
  0xc9   : > { %v685_v37 = vadd.f32 %v653_v33, %v488_v35  ;;  %v560_v38 = vpop.permute.xlu0 %559  ;;  %v755_v39 = vmax.f32 %v723_v36, 0.0 }
  0xca   : > { %v654_v40 = vmul.f32 %v2050_v61, %v560_v38  ;;  %v376_v41 = vpop.permute.xlu1 %375 }
  0xcb   : > { %v489_v42 = vmul.f32 %v2045_v60, %v376_v41  ;;  %1574 = vmatprep.mubr.f32.mxu0 %v755_v39  ;;  %v724_v43 = vadd.f32 %v2059_v4, %v685_v37 }
  0xcd   : > { %v686_v44 = vadd.f32 %v654_v40, %v489_v42  ;;  %v564_v45 = vpop.permute.xlu0 %563  ;;  %v756_v46 = vmax.f32 %v724_v43, 0.0 }
  0xce   : > { %v655_v47 = vmul.f32 %v2050_v61, %v564_v45  ;;  %v381_v48 = vpop.permute.xlu1 %380 }
  0xcf   : > { %v490_v49 = vmul.f32 %v2045_v60, %v381_v48  ;;  %1575 = vmatmul.mubr.f32.gmra.mrb[10].mxu0 %v756_v46  ;;  %v725_v50 = vadd.f32 %v2059_v4, %v686_v44 }
  0xd1   : > { %v687_v51 = vadd.f32 %v655_v47, %v490_v49  ;;  %v568_v52 = vpop.permute.xlu0 %567  ;;  %v757_v53 = vmax.f32 %v725_v50, 0.0 }
  0xd2   : > { %v656_v54 = vmul.f32 %v2050_v61, %v568_v52  ;;  %v386_v55 = vpop.permute.xlu1 %385 }
  0xd3   : > { %v491_v56 = vmul.f32 %v2045_v60, %v386_v55  ;;  %1577 = vmatprep.mubr.f32.mxu0 %v757_v53  ;;  %v726_v57 = vadd.f32 %v2059_v4, %v687_v51 }
  0xd5   : > { %v688_v58 = vadd.f32 %v656_v54, %v491_v56  ;;  %v572_v59 = vpop.permute.xlu0 %571  ;;  %v758_v62 = vmax.f32 %v726_v57, 0.0 }
  0xd6   : > { %v657_v63 = vmul.f32 %v2050_v61, %v572_v59  ;;  %v391_v0 = vpop.permute.xlu1 %390 }
  0xd7   : > { %v492_v1 = vmul.f32 %v2045_v60, %v391_v0  ;;  %1578 = vmatmul.mubr.f32.gmra.mrb[12].mxu0 %v758_v62  ;;  %v727_v2 = vadd.f32 %v2059_v4, %v688_v58 }
  0xd9   : > { %v689_v3 = vadd.f32 %v657_v63, %v492_v1  ;;  %v576_v5 = vpop.permute.xlu0 %575  ;;  %v759_v6 = vmax.f32 %v727_v2, 0.0 }
  0xda   : > { %v658_v7 = vmul.f32 %v2050_v61, %v576_v5  ;;  %v396_v8 = vpop.permute.xlu1 %395  ;;  %v1072_v5 = vld [vmem:[%s2369_s5 + $0x78] sm:$0xff] }
  0xdb   : > { %v493_v9 = vmul.f32 %v2045_v60, %v396_v8  ;;  %1580 = vmatprep.mubr.f32.mxu0 %v759_v6  ;;  %v728_v10 = vadd.f32 %v2059_v4, %v689_v3  ;;  %v1071_v3 = vld [vmem:[%s2369_s5 + $0x70] sm:$0xff] }
  0xdc   : > { %v1747_v8 = vpack.c.bf16 %v1072_v5, %v1071_v3 }
  0xdd   : > { %v690_v11 = vadd.f32 %v658_v7, %v493_v9  ;;  %v580_v12 = vpop.permute.xlu0 %579  ;;  %v760_v13 = vmax.f32 %v728_v10, 0.0 }
  0xde   : > { %v659_v14 = vmul.f32 %v2050_v61, %v580_v12  ;;  %v401_v15 = vpop.permute.xlu1 %400  ;;  %1748 = vmatprep.subr.bf16.mxu1 %v1747_v8 }
  0xdf   : > { %v494_v16 = vmul.f32 %v2045_v60, %v401_v15  ;;  %1581 = vmatmul.mubr.f32.gmra.mrb[14].mxu0 %v760_v13  ;;  %v729_v17 = vadd.f32 %v2059_v4, %v690_v11  ;;  %1750 = vmatpush3.bf16.msra.mxu1 %v1747_v8 }
  0xe1   : > { %v691_v18 = vadd.f32 %v659_v14, %v494_v16  ;;  %v584_v19 = vpop.permute.xlu0 %583  ;;  %v761_v20 = vmax.f32 %v729_v17, 0.0 }
  0xe2   : > { %v660_v21 = vmul.f32 %v2050_v61, %v584_v19  ;;  %v406_v22 = vpop.permute.xlu1 %405 }
  0xe3   : > { %v495_v23 = vmul.f32 %v2045_v60, %v406_v22  ;;  %1583 = vmatprep.mubr.f32.mxu0 %v761_v20  ;;  %v730_v24 = vadd.f32 %v2059_v4, %v691_v18 }
  0xe5   : > { %v692_v25 = vadd.f32 %v660_v21, %v495_v23  ;;  %v588_v26 = vpop.permute.xlu0 %587  ;;  %v762_v27 = vmax.f32 %v730_v24, 0.0 }
  0xe6   : > { %v661_v28 = vmul.f32 %v2050_v61, %v588_v26  ;;  %v411_v29 = vpop.permute.xlu1 %410 }
  0xe7   : > { %v496_v30 = vmul.f32 %v2045_v60, %v411_v29  ;;  %1584 = vmatmul.mubr.f32.gmra.mrb[16].mxu0 %v762_v27  ;;  %v731_v31 = vadd.f32 %v2059_v4, %v692_v25 }
  0xe9   : > { %v693_v32 = vadd.f32 %v661_v28, %v496_v30  ;;  %v592_v33 = vpop.permute.xlu0 %591  ;;  %v763_v34 = vmax.f32 %v731_v31, 0.0 }
  0xea   : > { %v662_v35 = vmul.f32 %v2050_v61, %v592_v33  ;;  %v416_v36 = vpop.permute.xlu1 %415 }
  0xeb   : > { %v497_v37 = vmul.f32 %v2045_v60, %v416_v36  ;;  %1586 = vmatprep.mubr.f32.mxu0 %v763_v34  ;;  %v732_v38 = vadd.f32 %v2059_v4, %v693_v32 }
  0xed   : > { %v694_v39 = vadd.f32 %v662_v35, %v497_v37  ;;  %v596_v40 = vpop.permute.xlu0 %595  ;;  %v764_v41 = vmax.f32 %v732_v38, 0.0 }
  0xee   : > { %v663_v42 = vmul.f32 %v2050_v61, %v596_v40  ;;  %v421_v43 = vpop.permute.xlu1 %420 }
  0xef   : > { %v498_v44 = vmul.f32 %v2045_v60, %v421_v43  ;;  %1587 = vmatmul.mubr.f32.gmra.mrb[18].mxu0 %v764_v41  ;;  %v733_v45 = vadd.f32 %v2059_v4, %v694_v39 }
  0xf1   : > { %v695_v46 = vadd.f32 %v663_v42, %v498_v44  ;;  %v600_v47 = vpop.permute.xlu0 %599  ;;  %v765_v48 = vmax.f32 %v733_v45, 0.0 }
  0xf2   : > { %v664_v49 = vmul.f32 %v2050_v61, %v600_v47  ;;  %v426_v50 = vpop.permute.xlu1 %425 }
  0xf3   : > { %v499_v51 = vmul.f32 %v2045_v60, %v426_v50  ;;  %1589 = vmatprep.mubr.f32.mxu0 %v765_v48  ;;  %v734_v52 = vadd.f32 %v2059_v4, %v695_v46 }
  0xf5   : > { %v696_v53 = vadd.f32 %v664_v49, %v499_v51  ;;  %v604_v54 = vpop.permute.xlu0 %603  ;;  %v766_v55 = vmax.f32 %v734_v52, 0.0 }
  0xf6   : > { %v665_v56 = vmul.f32 %v2050_v61, %v604_v54  ;;  %v431_v57 = vpop.permute.xlu1 %430 }
  0xf7   : > { %v500_v58 = vmul.f32 %v2045_v60, %v431_v57  ;;  %1590 = vmatmul.mubr.f32.gmra.mrb[20].mxu0 %v766_v55  ;;  %v735_v59 = vadd.f32 %v2059_v4, %v696_v53 }
  0xf9   : > { %v697_v62 = vadd.f32 %v665_v56, %v500_v58  ;;  %v608_v63 = vpop.permute.xlu0 %607  ;;  %v767_v0 = vmax.f32 %v735_v59, 0.0 }
  0xfa   : > { %v666_v1 = vmul.f32 %v2050_v61, %v608_v63  ;;  %v436_v2 = vpop.permute.xlu1 %435 }
  0xfb   : > { %v501_v6 = vmul.f32 %v2045_v60, %v436_v2  ;;  %1592 = vmatprep.mubr.f32.mxu0 %v767_v0  ;;  %v736_v7 = vadd.f32 %v2059_v4, %v697_v62  ;;  %v2204_v0 = vld [vmem:[%s2368_s4] ss:$0 sm:$0xff] }
  0xfd   : > { %v698_v9 = vadd.f32 %v666_v1, %v501_v6  ;;  %v612_v10 = vpop.permute.xlu0 %611  ;;  %v768_v11 = vmax.f32 %v736_v7, 0.0 }
  0xfe   : > { %v667_v12 = vmul.f32 %v2050_v61, %v612_v10  ;;  %v441_v13 = vpop.permute.xlu1 %440 }
  0xff   : > { %v502_v14 = vmul.f32 %v2045_v60, %v441_v13  ;;  %1593 = vmatmul.mubr.f32.gmra.mrb[22].mxu0 %v768_v11  ;;  %v737_v15 = vadd.f32 %v2059_v4, %v698_v9 }
 0x101   : > { %v699_v16 = vadd.f32 %v667_v12, %v502_v14  ;;  %v616_v17 = vpop.permute.xlu0 %615  ;;  %v769_v18 = vmax.f32 %v737_v15, 0.0 }
 0x102   : > { %v668_v19 = vmul.f32 %v2050_v61, %v616_v17  ;;  %v446_v20 = vpop.permute.xlu1 %445 }
 0x103   : > { %v503_v21 = vmul.f32 %v2045_v60, %v446_v20  ;;  %1595 = vmatprep.mubr.f32.mxu0 %v769_v18  ;;  %v738_v22 = vadd.f32 %v2059_v4, %v699_v16 }
 0x105   : > { %v700_v23 = vadd.f32 %v668_v19, %v503_v21  ;;  %v620_v24 = vpop.permute.xlu0 %619  ;;  %v770_v25 = vmax.f32 %v738_v22, 0.0 }
 0x106   : > { %v669_v26 = vmul.f32 %v2050_v61, %v620_v24  ;;  %v451_v27 = vpop.permute.xlu1 %450 }
 0x107   : > { %v504_v28 = vmul.f32 %v2045_v60, %v451_v27  ;;  %1596 = vmatmul.mubr.f32.gmra.mrb[24].mxu0 %v770_v25  ;;  %v739_v29 = vadd.f32 %v2059_v4, %v700_v23 }
 0x109   : > { %v701_v30 = vadd.f32 %v669_v26, %v504_v28  ;;  %v624_v31 = vpop.permute.xlu0 %623  ;;  %v771_v32 = vmax.f32 %v739_v29, 0.0 }
 0x10a   : > { %v670_v33 = vmul.f32 %v2050_v61, %v624_v31  ;;  %v456_v34 = vpop.permute.xlu1 %455 }
 0x10b   : > { %v505_v35 = vmul.f32 %v2045_v60, %v456_v34  ;;  %1598 = vmatprep.mubr.f32.mxu0 %v771_v32  ;;  %v740_v36 = vadd.f32 %v2059_v4, %v701_v30 }
 0x10d   : > { %v702_v37 = vadd.f32 %v670_v33, %v505_v35  ;;  %v628_v38 = vpop.permute.xlu0 %627  ;;  %v772_v39 = vmax.f32 %v740_v36, 0.0 }
 0x10e   : > { %v671_v40 = vmul.f32 %v2050_v61, %v628_v38  ;;  %v461_v41 = vpop.permute.xlu1 %460 }
 0x10f   : > { %v506_v42 = vmul.f32 %v2045_v60, %v461_v41  ;;  %1599 = vmatmul.mubr.f32.gmra.mrb[26].mxu0 %v772_v39  ;;  %v741_v43 = vadd.f32 %v2059_v4, %v702_v37 }
 0x111   : > { %v703_v44 = vadd.f32 %v671_v40, %v506_v42  ;;  %v632_v45 = vpop.permute.xlu0 %631  ;;  %v773_v46 = vmax.f32 %v741_v43, 0.0 }
 0x112   : > { %v672_v47 = vmul.f32 %v2050_v61, %v632_v45  ;;  %v466_v48 = vpop.permute.xlu1 %465 }
 0x113   : > { %v507_v49 = vmul.f32 %v2045_v60, %v466_v48  ;;  %1601 = vmatprep.mubr.f32.mxu0 %v773_v46  ;;  %v742_v50 = vadd.f32 %v2059_v4, %v703_v44 }
 0x115   : > { %v704_v51 = vadd.f32 %v672_v47, %v507_v49  ;;  %v636_v52 = vpop.permute.xlu0 %635  ;;  %v774_v53 = vmax.f32 %v742_v50, 0.0 }
 0x116   : > { %v673_v54 = vmul.f32 %v2050_v61, %v636_v52  ;;  %v471_v55 = vpop.permute.xlu1 %470 }
 0x117   : > { %v508_v56 = vmul.f32 %v2045_v60, %v471_v55  ;;  %1602 = vmatmul.mubr.f32.gmra.mrb[28].mxu0 %v774_v53  ;;  %v743_v57 = vadd.f32 %v2059_v4, %v704_v51 }
 0x119   : > { %v705_v58 = vadd.f32 %v673_v54, %v508_v56  ;;  %v775_v59 = vmax.f32 %v743_v57, 0.0 }
 0x11b   : > { %1604 = vmatprep.mubr.f32.mxu0 %v775_v59  ;;  %v744_v62 = vadd.f32 %v2059_v4, %v705_v58 }
 0x11d   : > { %v776_v63 = vmax.f32 %v744_v62, 0.0 }
 0x11f   : > { %1605 = vmatmul.mubr.f32.gmra.mrb[30].mxu0 %v776_v63 }
 0x17a   : > { %v1561_v1 = vpop.f32.mrb[0].mxu0 }
 0x17b   : > { %v872_v61 = vadd.f32 %v1561_v1, %v2204_v0  ;;  %v866_v2 = vpop.f32.mrb[1].mxu0 }
 0x17c   : > { %v867_v60 = vadd.f32 %v2204_v0, %v866_v2 }
 0x17d   : > { %v1026_v5 = vmax.f32 %v872_v61, 0.0 }
 0x17e   : > { %v1025_v3 = vmax.f32 %v867_v60, 0.0 }
 0x180   : > { %1639 = vmatprep.mubr.f32.mxu1 %v1025_v3 }
 0x181   : > { %1640 = vmatmul.mubr.f32.vlgmr.msra.gmra.mrb[0].mxu1 %v1026_v5 }
 0x182   : > { %v1564_v6 = vpop.f32.mrb[2].mxu0 }
 0x183   : > { %v882_v4 = vadd.f32 %v1564_v6, %v2204_v0  ;;  %v876_v7 = vpop.f32.mrb[3].mxu0 }
 0x184   : > { %v877_v8 = vadd.f32 %v2204_v0, %v876_v7 }
 0x185   : > { %v1028_v10 = vmax.f32 %v882_v4, 0.0 }
 0x186   : > { %v1027_v9 = vmax.f32 %v877_v8, 0.0 }
 0x188   : > { %1642 = vmatprep.mubr.f32.mxu1 %v1027_v9 }
 0x189   : > { %1643 = vmatmul.mubr.f32.gmra.mrb[2].mxu1 %v1028_v10 }
 0x18a   : > { %v1567_v11 = vpop.f32.mrb[4].mxu0 }
 0x18b   : > { %v892_v12 = vadd.f32 %v1567_v11, %v2204_v0  ;;  %v886_v13 = vpop.f32.mrb[5].mxu0 }
 0x18c   : > { %v887_v14 = vadd.f32 %v2204_v0, %v886_v13 }
 0x18d   : > { %v1030_v16 = vmax.f32 %v892_v12, 0.0 }
 0x18e   : > { %v1029_v15 = vmax.f32 %v887_v14, 0.0 }
 0x190   : > { %1645 = vmatprep.mubr.f32.mxu1 %v1029_v15 }
 0x191   : > { %1646 = vmatmul.mubr.f32.gmra.mrb[4].mxu1 %v1030_v16 }
 0x192   : > { %v1570_v17 = vpop.f32.mrb[6].mxu0 }
 0x193   : > { %v902_v18 = vadd.f32 %v1570_v17, %v2204_v0  ;;  %v896_v19 = vpop.f32.mrb[7].mxu0 }
 0x194   : > { %v897_v20 = vadd.f32 %v2204_v0, %v896_v19 }
 0x195   : > { %v1032_v22 = vmax.f32 %v902_v18, 0.0 }
 0x196   : > { %v1031_v21 = vmax.f32 %v897_v20, 0.0 }
 0x198   : > { %1648 = vmatprep.mubr.f32.mxu1 %v1031_v21 }
 0x199   : > { %1649 = vmatmul.mubr.f32.gmra.mrb[6].mxu1 %v1032_v22 }
 0x19a   : > { %v1573_v23 = vpop.f32.mrb[8].mxu0 }
 0x19b   : > { %v912_v24 = vadd.f32 %v1573_v23, %v2204_v0  ;;  %v906_v25 = vpop.f32.mrb[9].mxu0 }
 0x19c   : > { %v907_v26 = vadd.f32 %v2204_v0, %v906_v25 }
 0x19d   : > { %v1034_v28 = vmax.f32 %v912_v24, 0.0 }
 0x19e   : > { %v1033_v27 = vmax.f32 %v907_v26, 0.0 }
 0x1a0   : > { %1651 = vmatprep.mubr.f32.mxu1 %v1033_v27 }
 0x1a1   : > { %1652 = vmatmul.mubr.f32.gmra.mrb[8].mxu1 %v1034_v28 }
 0x1a2   : > { %v1576_v29 = vpop.f32.mrb[10].mxu0 }
 0x1a3   : > { %v922_v30 = vadd.f32 %v1576_v29, %v2204_v0  ;;  %v916_v31 = vpop.f32.mrb[11].mxu0 }
 0x1a4   : > { %v917_v32 = vadd.f32 %v2204_v0, %v916_v31 }
 0x1a5   : > { %v1036_v34 = vmax.f32 %v922_v30, 0.0 }
 0x1a6   : > { %v1035_v33 = vmax.f32 %v917_v32, 0.0  ;;  %v2244_v32 = vld [vmem:[%s2370_s6] ss:$0 sm:$0xff] }
 0x1a8   : > { %1654 = vmatprep.mubr.f32.mxu1 %v1035_v33 }
 0x1a9   : > { %1655 = vmatmul.mubr.f32.gmra.mrb[10].mxu1 %v1036_v34 }
 0x1aa   : > { %v1579_v35 = vpop.f32.mrb[12].mxu0 }
 0x1ab   : > { %v932_v36 = vadd.f32 %v1579_v35, %v2204_v0  ;;  %v926_v37 = vpop.f32.mrb[13].mxu0 }
 0x1ac   : > { %v927_v38 = vadd.f32 %v2204_v0, %v926_v37 }
 0x1ad   : > { %v1038_v40 = vmax.f32 %v932_v36, 0.0 }
 0x1ae   : > { %v1037_v39 = vmax.f32 %v927_v38, 0.0 }
 0x1b0   : > { %1657 = vmatprep.mubr.f32.mxu1 %v1037_v39 }
 0x1b1   : > { %1658 = vmatmul.mubr.f32.gmra.mrb[12].mxu1 %v1038_v40 }
 0x1b2   : > { %v1582_v41 = vpop.f32.mrb[14].mxu0 }
 0x1b3   : > { %v942_v42 = vadd.f32 %v1582_v41, %v2204_v0  ;;  %v936_v43 = vpop.f32.mrb[15].mxu0 }
 0x1b4   : > { %v937_v44 = vadd.f32 %v2204_v0, %v936_v43 }
 0x1b5   : > { %v1040_v46 = vmax.f32 %v942_v42, 0.0 }
 0x1b6   : > { %v1039_v45 = vmax.f32 %v937_v44, 0.0 }
 0x1b8   : > { %1660 = vmatprep.mubr.f32.mxu1 %v1039_v45 }
 0x1b9   : > { %1661 = vmatmul.mubr.f32.gmra.mrb[14].mxu1 %v1040_v46 }
 0x1ba   : > { %v1585_v47 = vpop.f32.mrb[16].mxu0 }
 0x1bb   : > { %v952_v48 = vadd.f32 %v1585_v47, %v2204_v0  ;;  %v946_v49 = vpop.f32.mrb[17].mxu0 }
 0x1bc   : > { %v947_v50 = vadd.f32 %v2204_v0, %v946_v49 }
 0x1bd   : > { %v1042_v52 = vmax.f32 %v952_v48, 0.0 }
 0x1be   : > { %v1041_v51 = vmax.f32 %v947_v50, 0.0 }
 0x1c0   : > { %1663 = vmatprep.mubr.f32.mxu1 %v1041_v51 }
 0x1c1   : > { %1664 = vmatmul.mubr.f32.gmra.mrb[16].mxu1 %v1042_v52 }
 0x1c2   : > { %v1588_v53 = vpop.f32.mrb[18].mxu0 }
 0x1c3   : > { %v962_v54 = vadd.f32 %v1588_v53, %v2204_v0  ;;  %v956_v55 = vpop.f32.mrb[19].mxu0 }
 0x1c4   : > { %v957_v56 = vadd.f32 %v2204_v0, %v956_v55 }
 0x1c5   : > { %v1044_v58 = vmax.f32 %v962_v54, 0.0 }
 0x1c6   : > { %v1043_v57 = vmax.f32 %v957_v56, 0.0 }
 0x1c8   : > { %1666 = vmatprep.mubr.f32.mxu1 %v1043_v57 }
 0x1c9   : > { %1667 = vmatmul.mubr.f32.gmra.mrb[18].mxu1 %v1044_v58 }
 0x1ca   : > { %v1591_v59 = vpop.f32.mrb[20].mxu0 }
 0x1cb   : > { %v972_v62 = vadd.f32 %v1591_v59, %v2204_v0  ;;  %v966_v63 = vpop.f32.mrb[21].mxu0 }
 0x1cc   : > { %v967_v1 = vadd.f32 %v2204_v0, %v966_v63 }
 0x1cd   : > { %v1046_v2 = vmax.f32 %v972_v62, 0.0 }
 0x1ce   : > { %v1045_v61 = vmax.f32 %v967_v1, 0.0 }
 0x1d0   : > { %1669 = vmatprep.mubr.f32.mxu1 %v1045_v61 }
 0x1d1   : > { %1670 = vmatmul.mubr.f32.gmra.mrb[20].mxu1 %v1046_v2 }
 0x1d2   : > { %v1594_v60 = vpop.f32.mrb[22].mxu0 }
 0x1d3   : > { %v982_v3 = vadd.f32 %v1594_v60, %v2204_v0  ;;  %v976_v5 = vpop.f32.mrb[23].mxu0 }
 0x1d4   : > { %v977_v6 = vadd.f32 %v2204_v0, %v976_v5 }
 0x1d5   : > { %v1048_v7 = vmax.f32 %v982_v3, 0.0 }
 0x1d6   : > { %v1047_v4 = vmax.f32 %v977_v6, 0.0 }
 0x1d8   : > { %1672 = vmatprep.mubr.f32.mxu1 %v1047_v4 }
 0x1d9   : > { %1673 = vmatmul.mubr.f32.gmra.mrb[22].mxu1 %v1048_v7 }
 0x1da   : > { %v1597_v8 = vpop.f32.mrb[24].mxu0 }
 0x1db   : > { %v992_v9 = vadd.f32 %v1597_v8, %v2204_v0  ;;  %v986_v10 = vpop.f32.mrb[25].mxu0 }
 0x1dc   : > { %v987_v11 = vadd.f32 %v2204_v0, %v986_v10 }
 0x1dd   : > { %v1050_v13 = vmax.f32 %v992_v9, 0.0 }
 0x1de   : > { %v1049_v12 = vmax.f32 %v987_v11, 0.0 }
 0x1e0   : > { %1675 = vmatprep.mubr.f32.mxu1 %v1049_v12 }
 0x1e1   : > { %1676 = vmatmul.mubr.f32.gmra.mrb[24].mxu1 %v1050_v13 }
 0x1e2   : > { %v1600_v14 = vpop.f32.mrb[26].mxu0 }
 0x1e3   : > { %v1002_v15 = vadd.f32 %v1600_v14, %v2204_v0  ;;  %v996_v16 = vpop.f32.mrb[27].mxu0 }
 0x1e4   : > { %v997_v17 = vadd.f32 %v2204_v0, %v996_v16 }
 0x1e5   : > { %v1052_v19 = vmax.f32 %v1002_v15, 0.0 }
 0x1e6   : > { %v1051_v18 = vmax.f32 %v997_v17, 0.0 }
 0x1e8   : > { %1678 = vmatprep.mubr.f32.mxu1 %v1051_v18 }
 0x1e9   : > { %1679 = vmatmul.mubr.f32.gmra.mrb[26].mxu1 %v1052_v19 }
 0x1ea   : > { %v1603_v20 = vpop.f32.mrb[28].mxu0 }
 0x1eb   : > { %v1012_v21 = vadd.f32 %v1603_v20, %v2204_v0  ;;  %v1006_v22 = vpop.f32.mrb[29].mxu0 }
 0x1ec   : > { %v1007_v23 = vadd.f32 %v2204_v0, %v1006_v22 }
 0x1ed   : > { %v1054_v25 = vmax.f32 %v1012_v21, 0.0 }
 0x1ee   : > { %v1053_v24 = vmax.f32 %v1007_v23, 0.0 }
 0x1f0   : > { %1681 = vmatprep.mubr.f32.mxu1 %v1053_v24 }
 0x1f1   : > { %1682 = vmatmul.mubr.f32.gmra.mrb[28].mxu1 %v1054_v25 }
 0x1f2   : > { %v1606_v26 = vpop.f32.mrb[30].mxu0 }
 0x1f3   : > { %v1022_v27 = vadd.f32 %v1606_v26, %v2204_v0  ;;  %v1016_v28 = vpop.f32.mrb[31].mxu0 }
 0x1f4   : > { %v1017_v29 = vadd.f32 %v2204_v0, %v1016_v28 }
 0x1f5   : > { %v1056_v31 = vmax.f32 %v1022_v27, 0.0 }
 0x1f6   : > { %v1055_v30 = vmax.f32 %v1017_v29, 0.0 }
 0x1f8   : > { %1684 = vmatprep.mubr.f32.mxu1 %v1055_v30 }
 0x1f9   : > { %1685 = vmatmul.mubr.f32.gmra.mrb[30].mxu1 %v1056_v31 }
 0x254   : > { %v1641_v33 = vpop.f32.mrb[0].mxu1 }
 0x255   : > { %v1152_v34 = vadd.f32 %v1641_v33, %v2244_v32  ;;  %v1146_v35 = vpop.f32.mrb[1].mxu1 }
 0x256   : > { %v1147_v36 = vadd.f32 %v2244_v32, %v1146_v35 }
 0x257   : > { %1306 = vst [vmem:[%s2248_s8 + $0x8] sm:$0xff] %v1152_v34 }
 0x258   : > { %1305 = vst [vmem:[%s2248_s8] sm:$0xff] %v1147_v36 }
 0x25c   : > { %v1644_v0 = vpop.f32.mrb[2].mxu1 }
 0x25d   : > { %v1162_v37 = vadd.f32 %v1644_v0, %v2244_v32  ;;  %v1156_v38 = vpop.f32.mrb[3].mxu1 }
 0x25e   : > { %v1157_v39 = vadd.f32 %v2244_v32, %v1156_v38 }
 0x25f   : > { %1308 = vst [vmem:[%s2248_s8 + $0x18] sm:$0xff] %v1162_v37 }
 0x260   : > { %1307 = vst [vmem:[%s2248_s8 + $0x10] sm:$0xff] %v1157_v39 }
 0x264   : > { %v1647_v40 = vpop.f32.mrb[4].mxu1 }
 0x265   : > { %v1172_v41 = vadd.f32 %v1647_v40, %v2244_v32  ;;  %v1166_v42 = vpop.f32.mrb[5].mxu1 }
 0x266   : > { %v1167_v43 = vadd.f32 %v2244_v32, %v1166_v42 }
 0x267   : > { %1310 = vst [vmem:[%s2248_s8 + $0x28] sm:$0xff] %v1172_v41 }
 0x268   : > { %1309 = vst [vmem:[%s2248_s8 + $0x20] sm:$0xff] %v1167_v43 }
 0x26c   : > { %v1650_v44 = vpop.f32.mrb[6].mxu1 }
 0x26d   : > { %v1182_v45 = vadd.f32 %v1650_v44, %v2244_v32  ;;  %v1176_v46 = vpop.f32.mrb[7].mxu1 }
 0x26e   : > { %v1177_v47 = vadd.f32 %v2244_v32, %v1176_v46 }
 0x26f   : > { %1312 = vst [vmem:[%s2248_s8 + $0x38] sm:$0xff] %v1182_v45 }
 0x270   : > { %1311 = vst [vmem:[%s2248_s8 + $0x30] sm:$0xff] %v1177_v47 }
 0x274   : > { %v1653_v48 = vpop.f32.mrb[8].mxu1 }
 0x275   : > { %v1192_v49 = vadd.f32 %v1653_v48, %v2244_v32  ;;  %v1186_v50 = vpop.f32.mrb[9].mxu1 }
 0x276   : > { %v1187_v51 = vadd.f32 %v2244_v32, %v1186_v50 }
 0x277   : > { %1314 = vst [vmem:[%s2248_s8 + $0x48] sm:$0xff] %v1192_v49 }
 0x278   : > { %1313 = vst [vmem:[%s2248_s8 + $0x40] sm:$0xff] %v1187_v51 }
 0x27c   : > { %v1656_v52 = vpop.f32.mrb[10].mxu1 }
 0x27d   : > { %v1202_v53 = vadd.f32 %v1656_v52, %v2244_v32  ;;  %v1196_v54 = vpop.f32.mrb[11].mxu1 }
 0x27e   : > { %v1197_v55 = vadd.f32 %v2244_v32, %v1196_v54 }
 0x27f   : > { %1316 = vst [vmem:[%s2248_s8 + $0x58] sm:$0xff] %v1202_v53 }
 0x280   : > { %1315 = vst [vmem:[%s2248_s8 + $0x50] sm:$0xff] %v1197_v55 }
 0x284   : > { %v1659_v56 = vpop.f32.mrb[12].mxu1 }
 0x285   : > { %v1212_v57 = vadd.f32 %v1659_v56, %v2244_v32  ;;  %v1206_v58 = vpop.f32.mrb[13].mxu1 }
 0x286   : > { %v1207_v59 = vadd.f32 %v2244_v32, %v1206_v58 }
 0x287   : > { %1318 = vst [vmem:[%s2248_s8 + $0x68] sm:$0xff] %v1212_v57 }
 0x288   : > { %1317 = vst [vmem:[%s2248_s8 + $0x60] sm:$0xff] %v1207_v59 }
 0x28c   : > { %v1662_v62 = vpop.f32.mrb[14].mxu1 }
 0x28d   : > { %v1222_v63 = vadd.f32 %v1662_v62, %v2244_v32  ;;  %v1216_v1 = vpop.f32.mrb[15].mxu1 }
 0x28e   : > { %v1217_v61 = vadd.f32 %v2244_v32, %v1216_v1 }
 0x28f   : > { %1320 = vst [vmem:[%s2248_s8 + $0x78] sm:$0xff] %v1222_v63 }
 0x290   : > { %1319 = vst [vmem:[%s2248_s8 + $0x70] sm:$0xff] %v1217_v61 }
 0x294   : > { %v1665_v2 = vpop.f32.mrb[16].mxu1 }
 0x295   : > { %v1232_v60 = vadd.f32 %v1665_v2, %v2244_v32  ;;  %v1226_v3 = vpop.f32.mrb[17].mxu1 }
 0x296   : > { %v1227_v5 = vadd.f32 %v2244_v32, %v1226_v3 }
 0x297   : > { %1322 = vst [vmem:[%s2248_s8 + $0x88] sm:$0xff] %v1232_v60 }
 0x298   : > { %1321 = vst [vmem:[%s2248_s8 + $0x80] sm:$0xff] %v1227_v5 }
 0x29c   : > { %v1668_v6 = vpop.f32.mrb[18].mxu1 }
 0x29d   : > { %v1242_v4 = vadd.f32 %v1668_v6, %v2244_v32  ;;  %v1236_v7 = vpop.f32.mrb[19].mxu1 }
 0x29e   : > { %v1237_v8 = vadd.f32 %v2244_v32, %v1236_v7 }
 0x29f   : > { %1324 = vst [vmem:[%s2248_s8 + $0x98] sm:$0xff] %v1242_v4 }
 0x2a0   : > { %1323 = vst [vmem:[%s2248_s8 + $0x90] sm:$0xff] %v1237_v8 }
 0x2a4   : > { %v1671_v9 = vpop.f32.mrb[20].mxu1 }
 0x2a5   : > { %v1252_v10 = vadd.f32 %v1671_v9, %v2244_v32  ;;  %v1246_v11 = vpop.f32.mrb[21].mxu1 }
 0x2a6   : > { %v1247_v12 = vadd.f32 %v2244_v32, %v1246_v11 }
 0x2a7   : > { %1326 = vst [vmem:[%s2248_s8 + $0xa8] sm:$0xff] %v1252_v10 }
 0x2a8   : > { %1325 = vst [vmem:[%s2248_s8 + $0xa0] sm:$0xff] %v1247_v12 }
 0x2ac   : > { %v1674_v13 = vpop.f32.mrb[22].mxu1 }
 0x2ad   : > { %v1262_v14 = vadd.f32 %v1674_v13, %v2244_v32  ;;  %v1256_v15 = vpop.f32.mrb[23].mxu1 }
 0x2ae   : > { %v1257_v16 = vadd.f32 %v2244_v32, %v1256_v15 }
 0x2af   : > { %1328 = vst [vmem:[%s2248_s8 + $0xb8] sm:$0xff] %v1262_v14 }
 0x2b0   : > { %1327 = vst [vmem:[%s2248_s8 + $0xb0] sm:$0xff] %v1257_v16 }
 0x2b4   : > { %v1677_v17 = vpop.f32.mrb[24].mxu1 }
 0x2b5   : > { %v1272_v18 = vadd.f32 %v1677_v17, %v2244_v32  ;;  %v1266_v19 = vpop.f32.mrb[25].mxu1 }
 0x2b6   : > { %v1267_v20 = vadd.f32 %v2244_v32, %v1266_v19 }
 0x2b7   : > { %1330 = vst [vmem:[%s2248_s8 + $0xc8] sm:$0xff] %v1272_v18 }
 0x2b8   : > { %1329 = vst [vmem:[%s2248_s8 + $0xc0] sm:$0xff] %v1267_v20 }
 0x2bc   : > { %v1680_v21 = vpop.f32.mrb[26].mxu1 }
 0x2bd   : > { %v1282_v22 = vadd.f32 %v1680_v21, %v2244_v32  ;;  %v1276_v23 = vpop.f32.mrb[27].mxu1 }
 0x2be   : > { %v1277_v24 = vadd.f32 %v2244_v32, %v1276_v23 }
 0x2bf   : > { %1332 = vst [vmem:[%s2248_s8 + $0xd8] sm:$0xff] %v1282_v22 }
 0x2c0   : > { %1331 = vst [vmem:[%s2248_s8 + $0xd0] sm:$0xff] %v1277_v24 }
 0x2c4   : > { %v1683_v25 = vpop.f32.mrb[28].mxu1 }
 0x2c5   : > { %v1292_v26 = vadd.f32 %v1683_v25, %v2244_v32  ;;  %v1286_v27 = vpop.f32.mrb[29].mxu1 }
 0x2c6   : > { %v1287_v28 = vadd.f32 %v2244_v32, %v1286_v27 }
 0x2c7   : > { %1334 = vst [vmem:[%s2248_s8 + $0xe8] sm:$0xff] %v1292_v26 }
 0x2c8   : > { %1333 = vst [vmem:[%s2248_s8 + $0xe0] sm:$0xff] %v1287_v28 }
 0x2cc   : > { %v1686_v29 = vpop.f32.mrb[30].mxu1 }
 0x2cd   : > { %v1302_v30 = vadd.f32 %v1686_v29, %v2244_v32  ;;  %v1296_v31 = vpop.f32.mrb[31].mxu1 }
 0x2ce   : > { %v1297_v33 = vadd.f32 %v2244_v32, %v1296_v31 }
 0x2cf   : > { %1336 = vst [vmem:[%s2248_s8 + $0xf8] sm:$0xff] %v1302_v30 }
 0x2d0   : > { %1335 = vst [vmem:[%s2248_s8 + $0xf0] sm:$0xff] %v1297_v33 }
 0x2d1   : > { %1812 = shalt.err (!%p1809_p3)
}
 0x2d2   : > { %s1813_s21 = scalar_lea.hbm %s2314_s17, 4096  ;;  %s1817_s29 = scalar_lea.hbm %s2371_s7, 8192 }
 0x2d3   : > { %p1814_p4 = scmp.ne.s32.totalorder %s2314_s17, %s1813_s21  ;;  %p1818_p9 = scmp.lt.u32.totalorder %s2314_s17, %s2371_s7 }
 0x2d4   : > { %p1819_p10 = scmp.lt.u32.totalorder %s1817_s29, %s1813_s21  ;;  %p1821_p12 = scmp.lt.u32.totalorder %s1813_s21, %s2314_s17 }
 0x2d5   : > { %p1815_p7 = pnand %p1814_p4, %p1946_p5 }
 0x2d6   : > { %p1820_p11 = por %p1819_p10, %p1818_p9 }
 0x2d7   : > { %p1816_p8 = pneg %p1815_p7 }
 0x2d8   : > { %p1822_p13 = por %p1821_p12, %p1820_p11 }
 0x2da   : > { %p1823_p0 = pnand %p1822_p13, %p1816_p8 }
 0x2dc   : > { %1826 = shalt.err (!%p1823_p0)
}
 0x2dd   : > { %s1866_s14 = smov 128   ;;  %s1867_s15 = smov 8  }
 0x2de   : > { %1751 = dma.vmem_to_hbm [thread:$0]  (%p1946_p5), %s2316_s16, 4096, %s2314_s17, %s2323_s28, %s1866_s14, %s1866_s14, %s1867_s15  }
 0x2df PF: > { %p1757_p1 = scmp.ge.s32.totalorder %s1861_s27, 2  ;;  %s1366_s18 = sand.u32 1, %s1849_s24  }
 0x2e0   : > { %s1367_s19 = scalar_lea.sflag [#allocation3], %s1366_s18 }
 0x2e1   : > { %p1754_p2 = pnand %p1757_p1, %p1950_p6 }
 0x2e3   : > { %1844 = dma.done.wait (!%p1754_p2), %s1367_s19, 4096  }
 0x2e4   : > { %1846 = vsyncadd (!%p1754_p2), %s1367_s19, 4294963200  ;;  %p17_p3 = scmp.ge.s32.totalorder %s1933_s30, 4   ;;  %s2374_s24 = smov %s1853_s25 }
 0x2e5   : > { %s2375_s25 = smov %s1857_s26  ;;  %s2376_s26 = smov %s1944_s10 }
 0x2e6   : > { %s2377_s27 = smov %s1933_s30  ;;  %19 = sbr.rel (!%p17_p3) target bundleno = 3 (0x3), region = 83 }
 0x2ed   :  { %1372 = vsyncpa [#allocation3], 1 }
 0x2ee   :  { %1374 = vsyncpa [#allocation3 + $0x1], 1 }

</bundles_post_ra>
